<compile_context>
chip_gen: v7x
topology: tpu7x:2x2x1
jax: 0.10.0
libtpu: 0.0.40
codegen_flags: <defaults>
</compile_context>

<pallas_src>
import functools

import jax
import jax.numpy as jnp
from jax.experimental import pallas as pl
from jax.experimental.pallas import tpu as pltpu

LN_EPS = 1e-5
_LANE = 128
_SUBLANE = 8


def _round_up(v, m):
    return (v + m - 1) // m * m


def _vmem_capacity_bytes():
    """Per-core VMEM capacity; conservative 64 MiB fallback if unavailable."""
    try:
        return int(pltpu.get_tpu_info().vmem_capacity_bytes)
    except Exception:
        return 64 * 1024 * 1024


def _head_kernel(*refs, n_tokens, token_tile, use_emitter, mask_tokens):
    if use_emitter:
        (x_ref, emitter_ref, gamma_ref, beta_ref, wh_x_ref, wh_e_ref, bh_ref,
         wo_ref, bo_ref, out_ref, acc_ref) = refs
    else:
        (x_ref, gamma_ref, beta_ref, wo_ref, bo_ref, out_ref, acc_ref) = refs

    n = pl.program_id(1)

    @pl.when(n == 0)
    def _init():
        acc_ref[...] = jnp.zeros_like(acc_ref)

    # Token-sum accumulation in f32 (correct for bf16 inputs too).  The
    # accumulator keeps the x tile's plane layout (TB, 1, E) so the per-step
    # sublane reduction does not need a relayout into a packed (TB, E) buffer;
    # the squeeze happens once per batch tile in the finalize step.
    x = x_ref[...].astype(jnp.float32)                       # (TB, TN, E)
    if mask_tokens:
        # Unpadded x: mask the out-of-range tokens of the partial last tile.
        tok = n * token_tile + jax.lax.broadcasted_iota(jnp.int32, x.shape, 1)
        x = jnp.where(tok < n_tokens, x, 0.0)
    acc_ref[...] += jnp.sum(x, axis=1, keepdims=True)        # (TB, 1, E)

    @pl.when(n == pl.num_programs(1) - 1)
    def _finalize():
        # Mean over the *true* token count (masked tokens contributed zeros).
        xm = jnp.squeeze(acc_ref[...], axis=1) * (1.0 / n_tokens)   # (TB, E)
        # LayerNorm over last dim (biased variance, like nn.LayerNorm).
        mu = jnp.mean(xm, axis=-1, keepdims=True)
        var = jnp.mean((xm - mu) ** 2, axis=-1, keepdims=True)
        xn = (xm - mu) * jax.lax.rsqrt(var + LN_EPS)
        xn = xn * gamma_ref[...] + beta_ref[...]                    # (TB, E)
        if use_emitter:
            # hidden(cat([xn, emitter])) == xn @ Wh_x + emitter @ Wh_e + bh
            feat = (jnp.dot(xn, wh_x_ref[...],
                            preferred_element_type=jnp.float32)
                    + jnp.dot(emitter_ref[...].astype(jnp.float32),
                              wh_e_ref[...],
                              preferred_element_type=jnp.float32)
                    + bh_ref[...])                                  # (TB, Hp)
        else:
            feat = xn
        out = jnp.dot(feat, wo_ref[...],
                      preferred_element_type=jnp.float32) + bo_ref[...]
        out_ref[...] = out.astype(out_ref.dtype)


def classification_head(x, emitter, params, *, n_classes, use_emitter,
                        batch_tile=128, x_tile_bytes=None):
    """Pallas implementation of ClassificationHead.forward.

    x:       (B, N, E) float32 or bfloat16 (unpadded, streamed directly)
    emitter: (B, EMIT) one-hot
    params:  dict of pre-padded (lane-dense) weights, see init_params
    Returns  (B, n_classes) float32 logits.
    """
    B, N, E = x.shape
    itemsize = jnp.dtype(x.dtype).itemsize
    C_pad = params["wo"].shape[1]

    # ---- generation-aware budgets -------------------------------------------
    vmem_cap = _vmem_capacity_bytes()
    if x_tile_bytes is None:
        # ~10.7 MiB per tile on v7x (64 MiB VMEM/TC), 16 MiB on v5e/v6e (128 MiB).
        x_tile_bytes = int(min(16 * 1024 * 1024,
                               max(4 * 1024 * 1024, vmem_cap // 6)))

    # ---- batch tile (multiple of 8, or the full tiny batch) ------------------
    if B <= _SUBLANE:
        TB = B                              # block == full dim: no sublane pad
    else:
        TB = min((B // _SUBLANE) * _SUBLANE, batch_tile)
        if B >= 16:
            # v7x megacore: only the "parallel" batch axis shards across the
            # two TensorCores -> guarantee at least two batch tiles.
            TB = min(TB, _round_up(pl.cdiv(B, 2), _SUBLANE))
        # Large-E safety: don't let the TN >= 8 floor blow the x tile budget.
        while TB > _SUBLANE and TB * _SUBLANE * E * itemsize > x_tile_bytes:
            TB = max(_SUBLANE, _round_up(TB // 2, _SUBLANE))

    # ---- token tile (multiple of 8, sized to the x tile byte budget) ---------
    if N <= _SUBLANE:
        TN = N
    else:
        tn_cap = max(_SUBLANE,
                     (x_tile_bytes // max(1, TB * E * itemsize))
                     // _SUBLANE * _SUBLANE)
        TN = min(max(_SUBLANE, (N // _SUBLANE) * _SUBLANE), tn_cap)

    grid = (pl.cdiv(B, TB), pl.cdiv(N, TN))
    mask_tokens = (N % TN) != 0

    x_spec = pl.BlockSpec((TB, TN, E), lambda b, n: (b, n, 0))

    def _weight_spec(shape):
        # Constant index_map -> block is DMA'd once and stays VMEM-resident.
        nd = len(shape)
        return pl.BlockSpec(shape, lambda b, n: (0,) * nd)

    gamma, beta = params["gamma"], params["beta"]
    wo, bo = params["wo"], params["bo"]

    if use_emitter:
        EMIT = emitter.shape[1]
        H_pad = params["wh_x"].shape[1]
        weights = (gamma, beta, params["wh_x"], params["wh_e"], params["bh"],
                   wo, bo)
        args = (x, emitter) + weights
        in_specs = [
            x_spec,
            pl.BlockSpec((TB, EMIT), lambda b, n: (b, 0)),
            _weight_spec((1, E)), _weight_spec((1, E)),
            _weight_spec((E, H_pad)), _weight_spec((EMIT, H_pad)),
            _weight_spec((1, H_pad)),
            _weight_spec((H_pad, C_pad)), _weight_spec((1, C_pad)),
        ]
        mm_flops = 2 * B * (E * H_pad + EMIT * H_pad + H_pad * C_pad)
        emitter_bytes = int(emitter.size) * jnp.dtype(emitter.dtype).itemsize
    else:
        weights = (gamma, beta, wo, bo)
        args = (x,) + weights
        in_specs = [
            x_spec,
            _weight_spec((1, E)), _weight_spec((1, E)),
            _weight_spec((E, C_pad)), _weight_spec((1, C_pad)),
        ]
        mm_flops = 2 * B * E * C_pad
        emitter_bytes = 0

    kernel = functools.partial(_head_kernel, n_tokens=N, token_tile=TN,
                               use_emitter=use_emitter, mask_tokens=mask_tokens)

    weight_bytes = sum(int(w.size) * jnp.dtype(w.dtype).itemsize
                       for w in weights)
    cost = pl.CostEstimate(
        flops=int(2 * B * N * E + 10 * B * E + mm_flops),
        transcendentals=int(B),
        bytes_accessed=int(x.size * itemsize + emitter_bytes + weight_bytes
                           + B * C_pad * 4),
    )

    # VMEM estimate: double-buffered x/emitter tiles + resident weights (x2 for
    # the default double buffer) + output tile + sublane-padded f32 accumulator.
    est = (2 * TB * TN * E * itemsize
           + 2 * TB * 32 * itemsize            # emitter tile (if any), rounded up
           + 2 * weight_bytes
           + 2 * TB * C_pad * 4
           + TB * _SUBLANE * E * 4)
    vmem_ceiling = max(32 * 1024 * 1024,
                       min(vmem_cap - 16 * 1024 * 1024, 100 * 1024 * 1024))
    vmem_limit = int(min(max(est + est // 2, 32 * 1024 * 1024), vmem_ceiling))

    out_padded = pl.pallas_call(
        kernel,
        out_shape=jax.ShapeDtypeStruct((B, C_pad), jnp.float32),
        grid_spec=pltpu.PrefetchScalarGridSpec(
            num_scalar_prefetch=0,
            grid=grid,
            in_specs=in_specs,
            out_specs=pl.BlockSpec((TB, C_pad), lambda b, n: (b, 0)),
            scratch_shapes=[pltpu.VMEM((TB, 1, E), jnp.float32)],
        ),
        compiler_params=pltpu.CompilerParams(
            dimension_semantics=("parallel", "arbitrary"),
            vmem_limit_bytes=vmem_limit,
        ),
        cost_estimate=cost,
    )(*args)

    return out_padded[:, :n_classes]


def init_params(key, emb_size, emitter_size, n_classes, use_emitter):
    """Synthetic params matching the nn.Module.  Linear weights are stored
    transposed (in, out) and pre-padded lane-dense (output/hidden dims padded
    to multiples of 128 with zeros) so the per-call wrapper does no HBM-side
    padding work."""
    ks = jax.random.split(key, 4)
    c_pad = _round_up(n_classes, _LANE)
    params = {
        "gamma": jnp.ones((1, emb_size), jnp.float32),
        "beta": jnp.zeros((1, emb_size), jnp.float32),
    }
    if use_emitter:
        hidden = emb_size + emitter_size
        h_pad = _round_up(hidden, _LANE)
        wh_t = 0.05 * jax.random.normal(ks[0], (hidden, hidden), jnp.float32)
        bh = 0.05 * jax.random.normal(ks[1], (1, hidden), jnp.float32)
        # Split into x-rows / emitter-rows so the kernel needs no concat.
        params["wh_x"] = jnp.pad(wh_t[:emb_size, :], ((0, 0), (0, h_pad - hidden)))
        params["wh_e"] = jnp.pad(wh_t[emb_size:, :], ((0, 0), (0, h_pad - hidden)))
        params["bh"] = jnp.pad(bh, ((0, 0), (0, h_pad - hidden)))
        lin_in, lin_in_pad = hidden, h_pad
    else:
        lin_in, lin_in_pad = emb_size, emb_size
    wo = 0.05 * jax.random.normal(ks[2], (lin_in, n_classes), jnp.float32)
    bo = 0.05 * jax.random.normal(ks[3], (1, n_classes), jnp.float32)
    params["wo"] = jnp.pad(wo, ((0, lin_in_pad - lin_in), (0, c_pad - n_classes)))
    params["bo"] = jnp.pad(bo, ((0, 0), (0, c_pad - n_classes)))
    return params


def _reference(x, emitter, params, *, n_classes, use_emitter):
    """Plain-JAX reference (uses the unpadded slices of the stored params)."""
    xm = jnp.mean(x.astype(jnp.float32), axis=1)
    mu = jnp.mean(xm, axis=-1, keepdims=True)
    var = jnp.mean((xm - mu) ** 2, axis=-1, keepdims=True)
    xn = (xm - mu) / jnp.sqrt(var + LN_EPS) * params["gamma"] + params["beta"]
    if use_emitter:
        H = x.shape[-1] + emitter.shape[-1]
        cat = jnp.concatenate([xn, emitter], axis=1)
        wh = jnp.concatenate([params["wh_x"][:, :H], params["wh_e"][:, :H]],
                             axis=0)
        xn = cat @ wh + params["bh"][:, :H]
        wo = params["wo"][:H, :n_classes]
    else:
        wo = params["wo"][:, :n_classes]
    return xn @ wo + params["bo"][:, :n_classes]


if __name__ == "__main__":
    # Small shapes consistent with the module's 'b n e' input + emitter one-hot.
    B, N, E = 2, 8, 32
    EMIT = 26            # len(EMITTER_ONE_HOT_MAP)
    N_CLASSES = 16

    key = jax.random.PRNGKey(0)
    kx, ke, kp = jax.random.split(key, 3)
    x = jax.random.normal(kx, (B, N, E), jnp.float32)
    emitter_idx = jax.random.randint(ke, (B,), 0, EMIT)
    emitter = jax.nn.one_hot(emitter_idx, EMIT, dtype=jnp.float32)

    ok = True
    for use_emitter in (False, True):
        params = init_params(kp, E, EMIT, N_CLASSES, use_emitter)
        head = jax.jit(functools.partial(classification_head,
                                         n_classes=N_CLASSES,
                                         use_emitter=use_emitter))
        out = jax.block_until_ready(head(x, emitter, params))
        ref = _reference(x, emitter, params, n_classes=N_CLASSES,
                         use_emitter=use_emitter)
        ok = ok and bool(jnp.allclose(out, ref, atol=1e-5, rtol=1e-5))

    print("KERNEL_OK" if ok else "MISMATCH")
</pallas_src>

<mosaic_0001>
module attributes {stable_mosaic.version = 11 : i64} {
  func.func @_head_kernel(%arg0: i32, %arg1: i32, %arg2: memref<2x8x32xf32, #tpu.memory_space<vmem>>, %arg3: memref<1x32xf32, #tpu.memory_space<vmem>>, %arg4: memref<1x32xf32, #tpu.memory_space<vmem>>, %arg5: memref<32x128xf32, #tpu.memory_space<vmem>>, %arg6: memref<1x128xf32, #tpu.memory_space<vmem>>, %arg7: memref<2x128xf32, #tpu.memory_space<vmem>>, %arg8: memref<2x1x32xf32, #tpu.memory_space<vmem>>) attributes {dimension_semantics = [#tpu.dimension_semantics<parallel>, #tpu.dimension_semantics<arbitrary>], iteration_bounds = array<i64: 1, 1>, scalar_prefetch = 0 : i64, scratch_operands = 1 : i64, tpu.core_type = #tpu.core_type<tc>, window_params = [{transform_indices = @transform_0, window_bounds = array<i64: 2, 8, 32>}, {pipeline_mode = #tpu.pipeline_mode<synchronous>, transform_indices = @transform_1, window_bounds = array<i64: 1, 32>}, {pipeline_mode = #tpu.pipeline_mode<synchronous>, transform_indices = @transform_2, window_bounds = array<i64: 1, 32>}, {pipeline_mode = #tpu.pipeline_mode<synchronous>, transform_indices = @transform_3, window_bounds = array<i64: 32, 128>}, {pipeline_mode = #tpu.pipeline_mode<synchronous>, transform_indices = @transform_4, window_bounds = array<i64: 1, 128>}, {transform_indices = @transform_5, window_bounds = array<i64: 2, 128>}]} {
    %c0_i32 = arith.constant 0 : i32
    %0 = arith.cmpi eq, %arg1, %c0_i32 : i32
    %1 = arith.extui %0 : i1 to i32
    %c0_i32_0 = arith.constant 0 : i32
    %2 = arith.cmpi ne, %1, %c0_i32_0 : i32
    scf.if %2 {
      %cst_11 = arith.constant 0.000000e+00 : f32
      %12 = vector.broadcast %cst_11 : f32 to vector<2x1x32xf32>
      %c0_12 = arith.constant 0 : index
      %c0_13 = arith.constant 0 : index
      %c0_14 = arith.constant 0 : index
      %13 = vector.load %arg8[%c0_12, %c0_13, %c0_14] : memref<2x1x32xf32, #tpu.memory_space<vmem>>, vector<2x1x32xf32>
      tpu.vector_store %arg8[%c0_12, %c0_13, %c0_14], %12 {strides = array<i32>} : memref<2x1x32xf32, #tpu.memory_space<vmem>>, vector<2x1x32xf32>,
    } else {
    }
    %c0 = arith.constant 0 : index
    %c0_1 = arith.constant 0 : index
    %c0_2 = arith.constant 0 : index
    %3 = vector.load %arg2[%c0, %c0_1, %c0_2] : memref<2x8x32xf32, #tpu.memory_space<vmem>>, vector<2x8x32xf32>
    %c0_3 = arith.constant 0 : index
    %c0_4 = arith.constant 0 : index
    %c0_5 = arith.constant 0 : index
    %4 = vector.load %arg8[%c0_3, %c0_4, %c0_5] : memref<2x1x32xf32, #tpu.memory_space<vmem>>, vector<2x1x32xf32>
    %cst = arith.constant dense<0.000000e+00> : vector<2x32xf32>
    %5 = vector.multi_reduction <add>, %3, %cst [1] : vector<2x8x32xf32> to vector<2x32xf32>
    %6 = vector.shape_cast %5 : vector<2x32xf32> to vector<2x1x32xf32>
    %7 = arith.addf %4, %6 : vector<2x1x32xf32>
    %c0_6 = arith.constant 0 : index
    %c0_7 = arith.constant 0 : index
    %c0_8 = arith.constant 0 : index
    %8 = vector.load %arg8[%c0_6, %c0_7, %c0_8] : memref<2x1x32xf32, #tpu.memory_space<vmem>>, vector<2x1x32xf32>
    tpu.vector_store %arg8[%c0_6, %c0_7, %c0_8], %7 {strides = array<i32>} : memref<2x1x32xf32, #tpu.memory_space<vmem>>, vector<2x1x32xf32>,
    %c0_i32_9 = arith.constant 0 : i32
    %9 = arith.cmpi eq, %arg1, %c0_i32_9 : i32
    %10 = arith.extui %9 : i1 to i32
    %c0_i32_10 = arith.constant 0 : i32
    %11 = arith.cmpi ne, %10, %c0_i32_10 : i32
    scf.if %11 {
      %c0_11 = arith.constant 0 : index
      %c0_12 = arith.constant 0 : index
      %c0_13 = arith.constant 0 : index
      %12 = vector.load %arg8[%c0_11, %c0_12, %c0_13] : memref<2x1x32xf32, #tpu.memory_space<vmem>>, vector<2x1x32xf32>
      %13 = vector.shape_cast %12 : vector<2x1x32xf32> to vector<2x32xf32>
      %cst_14 = arith.constant 1.250000e-01 : f32
      %14 = vector.broadcast %cst_14 : f32 to vector<2x32xf32>
      %15 = arith.mulf %13, %14 : vector<2x32xf32>
      %cst_15 = arith.constant dense<0.000000e+00> : vector<2xf32>
      %16 = vector.multi_reduction <add>, %15, %cst_15 [1] : vector<2x32xf32> to vector<2xf32>
      %17 = vector.shape_cast %16 : vector<2xf32> to vector<2x1xf32>
      %cst_16 = arith.constant 3.200000e+01 : f32
      %18 = vector.broadcast %cst_16 : f32 to vector<2x1xf32>
      %19 = arith.divf %17, %18 : vector<2x1xf32>
      %20 = vector.broadcast %19 : vector<2x1xf32> to vector<2x32xf32>
      %21 = arith.subf %15, %20 : vector<2x32xf32>
      %22 = arith.mulf %21, %21 : vector<2x32xf32>
      %cst_17 = arith.constant dense<0.000000e+00> : vector<2xf32>
      %23 = vector.multi_reduction <add>, %22, %cst_17 [1] : vector<2x32xf32> to vector<2xf32>
      %24 = vector.shape_cast %23 : vector<2xf32> to vector<2x1xf32>
      %cst_18 = arith.constant 3.200000e+01 : f32
      %25 = vector.broadcast %cst_18 : f32 to vector<2x1xf32>
      %26 = arith.divf %24, %25 : vector<2x1xf32>
      %27 = vector.broadcast %19 : vector<2x1xf32> to vector<2x32xf32>
      %28 = arith.subf %15, %27 : vector<2x32xf32>
      %cst_19 = arith.constant 9.99999974E-6 : f32
      %29 = vector.broadcast %cst_19 : f32 to vector<2x1xf32>
      %30 = arith.addf %26, %29 : vector<2x1xf32>
      %31 = math.rsqrt %30 : vector<2x1xf32>
      %32 = vector.broadcast %31 : vector<2x1xf32> to vector<2x32xf32>
      %33 = arith.mulf %28, %32 : vector<2x32xf32>
      %c0_20 = arith.constant 0 : index
      %c0_21 = arith.constant 0 : index
      %34 = vector.load %arg3[%c0_20, %c0_21] : memref<1x32xf32, #tpu.memory_space<vmem>>, vector<1x32xf32>
      %35 = vector.broadcast %34 : vector<1x32xf32> to vector<2x32xf32>
      %36 = arith.mulf %33, %35 : vector<2x32xf32>
      %c0_22 = arith.constant 0 : index
      %c0_23 = arith.constant 0 : index
      %37 = vector.load %arg4[%c0_22, %c0_23] : memref<1x32xf32, #tpu.memory_space<vmem>>, vector<1x32xf32>
      %38 = vector.broadcast %37 : vector<1x32xf32> to vector<2x32xf32>
      %39 = arith.addf %36, %38 : vector<2x32xf32>
      %c0_24 = arith.constant 0 : index
      %c0_25 = arith.constant 0 : index
      %40 = vector.load %arg5[%c0_24, %c0_25] : memref<32x128xf32, #tpu.memory_space<vmem>>, vector<32x128xf32>
      %cst_26 = arith.constant dense<0.000000e+00> : vector<2x128xf32>
      %41 = tpu.matmul %39, %40, %cst_26 {dimension_numbers = #tpu.dot_dimension_numbers<[1], [0], [0], [1], [0, 0, 1, 1], [], []>} : vector<2x32xf32>, vector<32x128xf32>, vector<2x128xf32> -> vector<2x128xf32>
      %c0_27 = arith.constant 0 : index
      %c0_28 = arith.constant 0 : index
      %42 = vector.load %arg6[%c0_27, %c0_28] : memref<1x128xf32, #tpu.memory_space<vmem>>, vector<1x128xf32>
      %43 = vector.broadcast %42 : vector<1x128xf32> to vector<2x128xf32>
      %44 = arith.addf %41, %43 : vector<2x128xf32>
      %c0_29 = arith.constant 0 : index
      %c0_30 = arith.constant 0 : index
      %45 = vector.load %arg7[%c0_29, %c0_30] : memref<2x128xf32, #tpu.memory_space<vmem>>, vector<2x128xf32>
      tpu.vector_store %arg7[%c0_29, %c0_30], %44 {strides = array<i32>} : memref<2x128xf32, #tpu.memory_space<vmem>>, vector<2x128xf32>,
    } else {
    }
    return
  }
  func.func @transform_0(%arg0: i32, %arg1: i32) -> (i32, i32, i32) {
    %c0_i32 = arith.constant 0 : i32
    %c0_i32_0 = arith.constant 0 : i32
    return %arg0, %arg1, %c0_i32 : i32, i32, i32
  }
  func.func @transform_1(%arg0: i32, %arg1: i32) -> (i32, i32) {
    %c0_i32 = arith.constant 0 : i32
    %c0_i32_0 = arith.constant 0 : i32
    %c0_i32_1 = arith.constant 0 : i32
    return %c0_i32, %c0_i32_0 : i32, i32
  }
  func.func @transform_2(%arg0: i32, %arg1: i32) -> (i32, i32) {
    %c0_i32 = arith.constant 0 : i32
    %c0_i32_0 = arith.constant 0 : i32
    %c0_i32_1 = arith.constant 0 : i32
    return %c0_i32, %c0_i32_0 : i32, i32
  }
  func.func @transform_3(%arg0: i32, %arg1: i32) -> (i32, i32) {
    %c0_i32 = arith.constant 0 : i32
    %c0_i32_0 = arith.constant 0 : i32
    %c0_i32_1 = arith.constant 0 : i32
    return %c0_i32, %c0_i32_0 : i32, i32
  }
  func.func @transform_4(%arg0: i32, %arg1: i32) -> (i32, i32) {
    %c0_i32 = arith.constant 0 : i32
    %c0_i32_0 = arith.constant 0 : i32
    %c0_i32_1 = arith.constant 0 : i32
    return %c0_i32, %c0_i32_0 : i32, i32
  }
  func.func @transform_5(%arg0: i32, %arg1: i32) -> (i32, i32) {
    %c0_i32 = arith.constant 0 : i32
    %c0_i32_0 = arith.constant 0 : i32
    return %arg0, %c0_i32 : i32, i32
  }
}

</mosaic_0001>

<bundles_post_ra>
// kernel: classification_head.1
= control target key start
LH: loop header
LB: loop body
LE: loop exit
PB: predicated region body
PF: predicated region fallthrough
CT: control target
= control target key end

     0   :  { %10 = vsyncpa [#allocation4], 0  ;;  %s549_s0 = inlined_call_operand.hbm [shape: f32[2,8,32], index: 0, kind: input, shape index: {}]   ;;  %s550_s1 = inlined_call_operand.vmem [shape: f32[1,32], index: 1, kind: input, shape index: {}]   ;;  %s551_s2 = inlined_call_operand.vmem [shape: f32[1,32], index: 2, kind: input, shape index: {}]   ;;  %s552_s3 = inlined_call_operand.hbm [shape: f32[32,128], index: 3, kind: input, shape index: {}]   ;;  %s553_s4 = inlined_call_operand.vmem [shape: f32[1,128], index: 4, kind: input, shape index: {}]   ;;  %s554_s5 = inlined_call_operand.hbm [shape: f32[2,128], index: 5, kind: output, shape index: {}]  }
   0x1   :  { %11 = vsyncpa [#allocation7], 0 }
   0x2   :  { %12 = vsyncpa [#allocation5], 0  ;;  %s453_s18 = smov [#allocation3]   ;;  %s381_s22 = scalar_lea.hbm %s549_s0, 256 }
   0x3   :  { %s18_s19 = sshll.u32 %s453_s18, 4  ;;  %p382_p0 = scmp.ne.s32.totalorder %s549_s0, %s381_s22  ;;  %s19_s19 = int_to_ptr.vmem [resolvable:$true] %s18_s19 }
   0x4   :  { %p385_p1 = scmp.lt.u32.totalorder %s381_s22, %s549_s0 }
   0x6   :  { %p387_p2 = pnand %p385_p1, %p382_p0 }
   0x8   :  { %390 = shalt.err (!%p387_p2)
}
   0x9   :  { %s391_s27 = scalar_lea.vmem %s19_s19, 256  ;;  %p396_p4 = scmp.lt.s32.totalorder %s19_s19, %s19_s19 }
   0xa   :  { %p392_p3 = scmp.ne.s32.totalorder %s19_s19, %s391_s27  ;;  %p397_p5 = scmp.lt.s32.totalorder %s391_s27, %s391_s27 }
   0xc   :  { %p398_p6 = por %p397_p5, %p396_p4 }
   0xe   :  { %p399_p7 = pnand %p398_p6, %p392_p3 }
  0x10   :  { %402 = shalt.err (!%p399_p7)
}
  0x11   :  { %s454_s28 = smov 128   ;;  %s455_s29 = smov 8  }
  0x12   :  { %24 = dma.hbm_to_vmem [thread:$0]  %s549_s0, 256, %s19_s19, [#allocation4], %s454_s28, %s454_s28, %s455_s29  }
  0x13   :  { %s456_s7 = smov [#allocation6]   ;;  %s403_s11 = scalar_lea.hbm %s552_s3, 512 }
  0x14   :  { %s34_s8 = sshll.u32 %s456_s7, 4  ;;  %p404_p8 = scmp.ne.s32.totalorder %s552_s3, %s403_s11  ;;  %s35_s8 = int_to_ptr.vmem [resolvable:$true] %s34_s8 }
  0x15   :  { %p407_p9 = scmp.lt.u32.totalorder %s403_s11, %s552_s3 }
  0x17   :  { %p409_p10 = pnand %p407_p9, %p404_p8 }
  0x19   :  { %412 = shalt.err (!%p409_p10)
}
  0x1a   :  { %s413_s16 = scalar_lea.vmem %s35_s8, 512  ;;  %p418_p12 = scmp.lt.s32.totalorder %s35_s8, %s35_s8 }
  0x1b   :  { %p414_p11 = scmp.ne.s32.totalorder %s35_s8, %s413_s16  ;;  %p419_p13 = scmp.lt.s32.totalorder %s413_s16, %s413_s16 }
  0x1d   :  { %p420_p0 = por %p419_p13, %p418_p12 }
  0x1f   :  { %p421_p1 = pnand %p420_p0, %p414_p11 }
  0x21   :  { %424 = shalt.err (!%p421_p1)
}
  0x22   :  { %40 = dma.hbm_to_vmem [thread:$0]  %s552_s3, 512, %s35_s8, [#allocation7], %s454_s28, %s454_s28, %s455_s29  }
  0x23   :  { %447 = dma.done.wait [#allocation4], 256  }
  0x24   :  { %448 = vsyncadd [#allocation4], 4294967040 }
  0x25   :  { %449 = dma.done.wait [#allocation7], 512  }
  0x26   :  { %450 = vsyncadd [#allocation7], 4294966784  ;;  %vm53_vm0 = vcmask 253952   ;;  %v457_v0 = vmov 0.0   ;;  %vm60_vm1 = vcmask 261120   ;;  %v56_v1 = vld [vmem:[#allocation3] sm:$0xff]  ;;  %v93_v23 = vlaneseq }
  0x27   :  { %54 = vst.msk [vmem:[#allocation2] sm:$0x1] %vm53_vm0, %v457_v0  ;;  %55 = vst.msk [vmem:[#allocation2 + $0x1] sm:$0x1] %vm53_vm0, %v457_v0  ;;  %v57_v2 = vld [vmem:[#allocation3 + $0x8] sm:$0xff]  ;;  %v61_v3 = vsel %vm60_vm1, %v56_v1, 0.0 }
  0x28   :  { %v68_v4 = vsel %vm60_vm1, %v57_v2, 0.0  ;;  %v62_v5 = vrot.slane %v61_v3, 4  ;;  %v458_v21 = vmov 1966171168   ;;  %v94_v25 = vshrl.u32 %v93_v23, 7  ;;  %v227_v49 = vld [vmem:[#allocation6] sm:$0xff] }
  0x29   :  { %v69_v6 = vrot.slane %v68_v4, 4  ;;  %v91_v22 = vunpack.c.l.s4 %v458_v21  ;;  %vm105_vm2 = vcmask 254976   ;;  %v228_v50 = vld [vmem:[#allocation6 + $0x8] sm:$0xff]  ;;  %v229_v51 = vld [vmem:[#allocation6 + $0x10] sm:$0xff]  ;;  %v459_v52 = vmov 0.0|0.0   ;;  %v230_v54 = vld [vmem:[#allocation6 + $0x18] sm:$0xff] }
  0x2a   :  { %v63_v7 = vadd.f32 %v62_v5, %v61_v3  ;;  %v114_v35 = vsub.s32 0, %v94_v25  ;;  %v118_v36 = vsub.s32 1, %v94_v25  ;;  %364 = vmatprep.subr.bf16.mxu0 %v459_v52  ;;  %v365_v53 = vpack.c.bf16 %v228_v50, %v227_v49  ;;  %v344_v59 = vld [vmem:[%s550_s1] ss:$0 sm:$0xff]  ;;  %s461_s21 = smov [#allocation8]  }
  0x2b   :  { %v70_v8 = vadd.f32 %v69_v6, %v68_v4  ;;  %v92_v24 = vunpack.c.0.s8 %v91_v22  ;;  %vm460_vm3 = vmmov 0   ;;  %v368_v55 = vpack.c.bf16 %v230_v54, %v229_v51  ;;  %v345_v60 = vld [vmem:[%s551_s2] ss:$0 sm:$0xff]  ;;  %s334_s22 = sshll.u32 %s461_s21, 4  ;;  %s335_s22 = int_to_ptr.vmem [resolvable:$true] %s334_s22 }
  0x2c   :  { %v64_v9 = vrot.slane %v63_v7, 2  ;;  %361 = vmatprep.mubr.msk.f32.mxu0 %vm460_vm3, %v457_v0  ;;  %366 = vmatpush3.bf16.msra.mxu0 %v365_v53  ;;  %s425_s23 = scalar_lea.vmem %s335_s22, 32  ;;  %p430_p3 = scmp.lt.s32.totalorder %s335_s22, %s335_s22 }
  0x2d   :  { %v71_v10 = vrot.slane %v70_v8, 2  ;;  %v95_v30 = vsub.s32 %v92_v24, %v94_v25  ;;  %367 = vmatprep.subr.bf16.mxu0 %v459_v52  ;;  %p426_p2 = scmp.ne.s32.totalorder %s335_s22, %s425_s23  ;;  %p431_p4 = scmp.lt.s32.totalorder %s425_s23, %s425_s23 }
  0x2e   :  { %v65_v11 = vadd.f32 %v64_v9, %v63_v7  ;;  %v58_v15 = vld [vmem:[#allocation2] sm:$0x1]  ;;  %v59_v16 = vld [vmem:[#allocation2 + $0x1] sm:$0x1] }
  0x2f   :  { %v72_v12 = vadd.f32 %v71_v10, %v70_v8  ;;  %v175_v61 = vrot.slane %v344_v59, %v95_v30  ;;  %v207_v62 = vrot.slane %v345_v60, %v95_v30  ;;  %p432_p5 = por %p431_p4, %p430_p3 }
  0x30   :  { %v66_v13 = vrot.slane %v65_v11, 1  ;;  %369 = vmatpush3.bf16.msra.mxu0 %v368_v55 }
  0x31   :  { %v73_v14 = vrot.slane %v72_v12, 1  ;;  %v176_v63 = vcombine.high %v175_v61, %v175_v61  ;;  %v208_v0 = vcombine.high %v207_v62, %v207_v62  ;;  %v183_v4 = vrot.slane %v175_v61, %v95_v30  ;;  %p433_p6 = pnand %p432_p5, %p426_p2 }
  0x32   :  { %v67_v17 = vadd.f32 %v66_v13, %v65_v11  ;;  %v215_v8 = vrot.slane %v207_v62, %v95_v30 }
  0x33   :  { %v74_v18 = vadd.f32 %v73_v14, %v72_v12  ;;  %v190_v5 = vrot.slane %v176_v63, %v95_v30  ;;  %v222_v9 = vrot.slane %v208_v0, %v95_v30 }
  0x34   :  { %v75_v19 = vadd.f32 %v67_v17, %v58_v15  ;;  %v346_v17 = vld [vmem:[%s553_s4] ss:$0 sm:$0xff] }
  0x35   :  { %v76_v20 = vadd.f32 %v74_v18, %v59_v16 }
  0x36   :  { %78 = vst.msk [vmem:[#allocation2] sm:$0x1] %vm53_vm0, %v75_v19 }
  0x37   :  { %79 = vst.msk [vmem:[#allocation2 + $0x1] sm:$0x1] %vm53_vm0, %v76_v20 }
  0x3d   :  { %v83_v26 = vld [vmem:[#allocation2] sm:$0x1] }
  0x3e   :  { %v84_v27 = vld [vmem:[#allocation2 + $0x1] sm:$0x1]  ;;  %v85_v28 = vmul.f32 0.125, %v83_v26 }
  0x3f   :  { %v86_v29 = vmul.f32 0.125, %v84_v27 }
  0x41   :  { %v89_v31 = vcombine.low %v85_v28, %v86_v29 }
  0x43   :  { %v96_v32 = vrot.slane %v89_v31, %v95_v30 }
  0x45   :  { %v103_v33 = vrot.slane %v96_v32, %v95_v30 }
  0x47   :  { %v106_v34 = vsel %vm105_vm2, %v103_v33, 0.0 }
  0x48   :  { %107 = vadd.xlane.f32.xlu0 %v106_v34 }
  0xd5   :  { %v108_v37 = vpop.xlane.xlu0 %107 }
  0xd6   :  { %v110_v38 = vmul.f32 0.03125, %v108_v37 }
  0xd8   :  { %v115_v39 = vrot.slane %v110_v38, %v114_v35  ;;  %v119_v40 = vrot.slane %v110_v38, %v118_v36 }
  0xda   :  { %v122_v41 = vsub.f32 %v85_v28, %v115_v39  ;;  %v123_v42 = vsub.f32 %v86_v29, %v119_v40 }
  0xdc   :  { %v124_v43 = vmul.f32 %v122_v41, %v122_v41  ;;  %v125_v44 = vmul.f32 %v123_v42, %v123_v42 }
  0xde   :  { %v128_v45 = vcombine.low %v124_v43, %v125_v44 }
  0xe0   :  { %v135_v46 = vrot.slane %v128_v45, %v95_v30 }
  0xe2   :  { %v142_v47 = vrot.slane %v135_v46, %v95_v30 }
  0xe4   :  { %v144_v48 = vsel %vm105_vm2, %v142_v47, 0.0 }
  0xe5   :  { %145 = vadd.xlane.f32.xlu0 %v144_v48 }
 0x172   :  { %v146_v56 = vpop.xlane.xlu0 %145 }
 0x173   :  { %v147_v57 = vmul.f32 0.03125, %v146_v56 }
 0x175   :  { %v148_v58 = vadd.f32 1e-05, %v147_v57 }
 0x177   :  { %379 = vrsqrt.f32 %v148_v58 }
 0x181   :  { %v380_v1 = vpop.eup %379 }
 0x182   :  { %v154_v2 = vrot.slane %v380_v1, %v114_v35  ;;  %v158_v3 = vrot.slane %v380_v1, %v118_v36 }
 0x184   :  { %v161_v6 = vmul.f32 %v154_v2, %v122_v41  ;;  %v162_v7 = vmul.f32 %v158_v3, %v123_v42 }
 0x186   :  { %v193_v10 = vmul.f32 %v183_v4, %v161_v6  ;;  %v194_v11 = vmul.f32 %v190_v5, %v162_v7 }
 0x188   :  { %v225_v12 = vadd.f32 %v215_v8, %v193_v10  ;;  %v226_v13 = vadd.f32 %v222_v9, %v194_v11 }
 0x18a   :  { %v240_v14 = vcombine.low %v225_v12, %v226_v13 }
 0x18c   :  { %v247_v15 = vrot.slane %v240_v14, %v95_v30 }
 0x18e   :  { %v254_v16 = vrot.slane %v247_v15, %v95_v30 }
 0x190   :  { %362 = vmatmul.mubr.msk.f32.vlgmr.msra.gmra.mrb[0].mxu0 %vm60_vm1, %v254_v16 }
 0x263   :  { %v323_v18 = vpop.f32.mrb[0].mxu0 }
 0x264   :  { %v324_v19 = vadd.f32 %v346_v17, %v323_v18  ;;  %v363_v20 = vpop.f32.mrb[1].mxu0 }
 0x266   :  { %327 = vst [vmem:[#allocation8] sm:$0x3] %v324_v19 }
 0x267   :  { %436 = shalt.err (!%p433_p6)
}
 0x268   :  { %s437_s26 = scalar_lea.hbm %s554_s5, 32 }
 0x269   :  { %p438_p7 = scmp.ne.s32.totalorder %s554_s5, %s437_s26  ;;  %p441_p8 = scmp.lt.u32.totalorder %s437_s26, %s554_s5 }
 0x26b   :  { %p443_p9 = pnand %p441_p8, %p438_p7 }
 0x26d   :  { %446 = shalt.err (!%p443_p9)
}
 0x26e   :  { %337 = dma.vmem_to_hbm [thread:$0]  %s335_s22, 32, %s554_s5, [#allocation5]  }
 0x26f   :  { %451 = dma.done.wait [#allocation5], 32  }
 0x270   :  { %452 = vsyncadd [#allocation5], 4294967264 }
 0x271   :  { %341 = vsyncpa [#allocation4], 1 }
 0x272   :  { %342 = vsyncpa [#allocation7], 1 }
 0x273   :  { %343 = vsyncpa [#allocation5], 1 }

</bundles_post_ra>
